<compile_context>
chip_gen: v7x
topology: tpu7x:2x2x1
jax: 0.10.0
libtpu: 0.0.40
codegen_flags: <defaults>
</compile_context>

<pallas_src>
import functools

import jax
import jax.numpy as jnp
from jax.experimental import pallas as pl
from jax.experimental.pallas import tpu as pltpu

PARAM_DTYPE = jnp.bfloat16


def _round_up(x, mult):
    return ((x + mult - 1) // mult) * mult


def _cdiv(a, b):
    return (a + b - 1) // b


def _chip_config():
    """Per-generation tile defaults, VMEM capacity and TensorCores per chip."""
    try:
        kind = jax.devices()[0].device_kind.lower()
    except Exception:
        kind = ""
    if "v6" in kind:                                   # v6e / Trillium: 1 TC, 128 MiB VMEM
        cfg = dict(tm=512, tf=512, vmem_cap=128 << 20, num_tc=1)
    elif "v7" in kind or "tpu7" in kind or "7x" in kind:   # v7x: 2 TCs, 64 MiB VMEM per TC
        cfg = dict(tm=256, tf=256, vmem_cap=64 << 20, num_tc=2)
    elif "v5 lite" in kind or "v5e" in kind or "v5lite" in kind:   # v5e: 1 TC, 128 MiB
        cfg = dict(tm=256, tf=512, vmem_cap=128 << 20, num_tc=1)
    elif "v5" in kind or "v4" in kind:                 # v5p / v4: megacore, 128 MiB
        cfg = dict(tm=256, tf=512, vmem_cap=128 << 20, num_tc=2)
    else:                                              # unknown chip: conservative
        cfg = dict(tm=256, tf=256, vmem_cap=64 << 20, num_tc=1)
    try:
        # Prefer the real hardware number when the query is available.
        cfg["vmem_cap"] = int(pltpu.get_tpu_info().vmem_capacity_bytes)
    except Exception:
        pass
    return cfg


def _pick_tf(ffn, tf_max):
    """Largest multiple of 128 <= tf_max that divides ffn (or full ffn for small ffn)."""
    if ffn <= 128:
        return ffn
    t = (min(tf_max, ffn) // 128) * 128
    while t >= 128:
        if ffn % t == 0:
            return t
        t -= 128
    return ffn  # no 128-multiple divisor (only if ffn wasn't padded); full block


def _vmem_estimate(tm, tf, hidden):
    """Double-buffered bf16 x/out/w1/w2 tiles + f32 accumulator + ReLU intermediate."""
    return (
        2 * tm * hidden * 2          # x tiles (bf16, double-buffered)
        + 2 * hidden * tf * 2        # w1 tiles
        + 2 * tf * hidden * 2        # w2 tiles
        + 2 * tm * hidden * 2        # out tiles
        + tm * hidden * 4            # fp32 accumulator scratch
        + tm * tf * (4 + 2)          # (tm, tf) h intermediate: f32 matmul result + bf16 copy
        + 2 * (tf + hidden) * 2      # biases (double-buffered)
    )


def mlp_kernel(x_ref, w1_ref, b1_ref, w2_ref, b2_ref, o_ref, acc_ref):
    # x_ref:  (tm, H)   bf16   row tile of flattened hidden_states
    # w1_ref: (H, tf)   bf16   F-tile of dense_h_to_4h.weight^T
    # b1_ref: (1, tf)   bf16
    # w2_ref: (tf, H)   bf16   F-tile of dense_4h_to_h.weight^T
    # b2_ref: (1, H)    bf16
    # o_ref:  (tm, H)   bf16
    # acc_ref:(tm, H)   f32    VMEM accumulator (persists across the f axis)
    f = pl.program_id(1)
    nf = pl.num_programs(1)

    @pl.when(f == 0)
    def _():
        acc_ref[...] = jnp.zeros_like(acc_ref)

    # dense_h_to_4h (complete over K = hidden for this F-slice) + bias1 + ReLU.
    h = jnp.dot(x_ref[...], w1_ref[...], preferred_element_type=jnp.float32)
    h = h + b1_ref[...].astype(jnp.float32)
    h = jnp.maximum(h, 0.0).astype(x_ref.dtype)

    # dense_4h_to_h partial contribution, accumulated in fp32.
    acc_ref[...] += jnp.dot(h, w2_ref[...], preferred_element_type=jnp.float32)

    @pl.when(f == nf - 1)
    def _():
        y = acc_ref[...] + b2_ref[...].astype(jnp.float32)
        o_ref[...] = y.astype(o_ref.dtype)


@functools.partial(jax.jit, static_argnames=("tm", "tf"))
def mlp_forward(x, w1_t, b1_2d, w2_t, b2_2d, *, tm=None, tf=None):
    """Fused MLP forward.

    x:     [..., hidden]   (bf16)
    w1_t:  (hidden, ffn)   pre-transposed (and ffn-padded) dense_h_to_4h weight
    b1_2d: (1, ffn)
    w2_t:  (ffn, hidden)   pre-transposed (and ffn-padded) dense_4h_to_h weight
    b2_2d: (1, hidden)
    """
    cfg = _chip_config()
    tm = cfg["tm"] if tm is None else tm
    tf = cfg["tf"] if tf is None else tf
    budget = int(0.85 * cfg["vmem_cap"])

    orig_shape = x.shape
    hidden = orig_shape[-1]
    ffn = w1_t.shape[1]

    x2d = x.reshape(-1, hidden)
    m = x2d.shape[0]

    # F tile: largest 128-multiple divisor of ffn (ffn is pre-padded to a multiple
    # of 512 when large, so this never degenerates to streaming the whole weight).
    tf_eff = _pick_tf(ffn, tf)

    # Row tile: multiple of 16 (bf16 sublane packing), never larger than needed.
    tm_eff = min(tm, _round_up(m, 16))

    # Megacore: guarantee >= 2 row tiles so the "parallel" i axis can be sharded
    # across TensorCores on 2-TC chips.
    if cfg["num_tc"] >= 2 and _cdiv(m, tm_eff) < 2 and m > 16:
        tm_eff = min(tm_eff, _round_up(_cdiv(m, 2), 16))

    # Shrink tiles until the estimate (with ~10% slack for compiler scratch) fits
    # the per-chip VMEM budget: give back the per-generation tm bump first (the
    # AI floor is ~256 rows), then tf, then tm further only if desperate.
    while _vmem_estimate(tm_eff, tf_eff, hidden) * 1.1 > budget:
        if tm_eff > 256:
            tm_eff = _round_up(max(256, tm_eff // 2), 16)
            continue
        new_tf = _pick_tf(ffn, max(128, tf_eff // 2)) if tf_eff > 128 else tf_eff
        if new_tf < tf_eff:
            tf_eff = new_tf
            continue
        if tm_eff > 16:
            tm_eff = _round_up(max(16, tm_eff // 2), 16)
            continue
        break

    m_pad = _round_up(m, tm_eff)
    if m_pad != m:
        x2d = jnp.pad(x2d, ((0, m_pad - m), (0, 0)))

    grid = (m_pad // tm_eff, ffn // tf_eff)

    est = _vmem_estimate(tm_eff, tf_eff, hidden)
    vmem_limit = int(min(max(est * 1.4 + (2 << 20), 16 << 20), budget))

    # Advisory cost estimate: weights are re-streamed once per row tile.
    n_row_tiles = grid[0]
    flops = 4 * m_pad * hidden * ffn
    bytes_accessed = (
        2 * m_pad * hidden * 2                              # x in + out
        + n_row_tiles * (2 * hidden * ffn * 2 + ffn * 2)    # w1 + w2 + b1 per row tile
        + hidden * 2                                        # b2
    )
    cost = pl.CostEstimate(flops=flops, transcendentals=0, bytes_accessed=bytes_accessed)

    out2d = pl.pallas_call(
        mlp_kernel,
        out_shape=jax.ShapeDtypeStruct((m_pad, hidden), x.dtype),
        grid_spec=pltpu.PrefetchScalarGridSpec(
            num_scalar_prefetch=0,
            grid=grid,
            in_specs=[
                pl.BlockSpec((tm_eff, hidden), lambda i, f: (i, 0)),   # x row tile
                pl.BlockSpec((hidden, tf_eff), lambda i, f: (0, f)),   # w1^T F-tile
                pl.BlockSpec((1, tf_eff), lambda i, f: (0, f)),        # b1 F-tile
                pl.BlockSpec((tf_eff, hidden), lambda i, f: (f, 0)),   # w2^T F-tile
                pl.BlockSpec((1, hidden), lambda i, f: (0, 0)),        # b2 (full)
            ],
            out_specs=pl.BlockSpec((tm_eff, hidden), lambda i, f: (i, 0)),
            scratch_shapes=[pltpu.VMEM((tm_eff, hidden), jnp.float32)],
        ),
        compiler_params=pltpu.CompilerParams(
            dimension_semantics=("parallel", "arbitrary"),
            vmem_limit_bytes=vmem_limit,
        ),
        cost_estimate=cost,
    )(x2d, w1_t, b1_2d, w2_t, b2_2d)

    if m_pad != m:
        out2d = out2d[:m]
    return out2d.reshape(orig_shape)


def init_mlp_params(key, hidden_size, ffn_dim, dtype=PARAM_DTYPE):
    """Deterministic init matching LinearNoInit: xavier_normal_ weights, zero bias.

    Returns PyTorch-layout params: w1 (ffn, hidden), b1 (ffn,), w2 (hidden, ffn), b2 (hidden,).
    """
    k1, k2 = jax.random.split(key)

    def xavier_normal(k, out_f, in_f):
        std = (2.0 / (in_f + out_f)) ** 0.5
        return (jax.random.normal(k, (out_f, in_f), jnp.float32) * std).astype(dtype)

    w1 = xavier_normal(k1, ffn_dim, hidden_size)   # dense_h_to_4h.weight
    b1 = jnp.zeros((ffn_dim,), dtype)
    w2 = xavier_normal(k2, hidden_size, ffn_dim)   # dense_4h_to_h.weight
    b2 = jnp.zeros((hidden_size,), dtype)
    return w1, b1, w2, b2


def prepare_mlp_params(w1, b1, w2, b2):
    """One-time layout prep (outside the hot path): transpose weights, make biases 2-D,
    and zero-pad the ffn axis to a multiple of 512 so the F tile always divides it.

    Padded ffn slots have zero w1 columns and zero b1 entries, so ReLU of the padded
    pre-activation is exactly 0 and (together with zero w2 rows) contributes nothing.
    """
    ffn, hidden = w1.shape
    ffn_pad = _round_up(ffn, 512) if ffn >= 512 else ffn
    w1_t = jnp.asarray(w1.T)            # (hidden, ffn)
    w2_t = jnp.asarray(w2.T)            # (ffn, hidden)
    b1_2d = b1.reshape(1, ffn)
    if ffn_pad != ffn:
        w1_t = jnp.pad(w1_t, ((0, 0), (0, ffn_pad - ffn)))
        w2_t = jnp.pad(w2_t, ((0, ffn_pad - ffn), (0, 0)))
        b1_2d = jnp.pad(b1_2d, ((0, 0), (0, ffn_pad - ffn)))
    b2_2d = b2.reshape(1, hidden)
    return w1_t, b1_2d, w2_t, b2_2d


if __name__ == "__main__":
    batch, seq, hidden, ffn = 2, 8, 32, 128

    key = jax.random.PRNGKey(0)
    kx, kp = jax.random.split(key)

    x = jax.random.normal(kx, (batch, seq, hidden), jnp.float32).astype(PARAM_DTYPE)
    w1, b1, w2, b2 = init_mlp_params(kp, hidden, ffn)
    params = prepare_mlp_params(w1, b1, w2, b2)

    out = mlp_forward(x, *params)
    out = jax.block_until_ready(out)

    # Pure-JAX reference of the same math (fp32 accumulate, bf16 intermediate).
    x2d_f32 = x.reshape(-1, hidden).astype(jnp.float32)
    ref_h = jnp.maximum(
        jnp.dot(x2d_f32, w1.T.astype(jnp.float32)) + b1.astype(jnp.float32), 0.0
    )
    ref = (
        jnp.dot(ref_h.astype(PARAM_DTYPE).astype(jnp.float32), w2.T.astype(jnp.float32))
        + b2.astype(jnp.float32)
    ).astype(PARAM_DTYPE).reshape(batch, seq, hidden)

    assert out.shape == (batch, seq, hidden)
    assert out.dtype == PARAM_DTYPE
    assert jnp.allclose(out.astype(jnp.float32), ref.astype(jnp.float32), atol=1e-1, rtol=1e-1)

    print("KERNEL_OK")
</pallas_src>

<mosaic_0001>
module attributes {stable_mosaic.version = 11 : i64} {
  func.func @mlp_kernel(%arg0: i32, %arg1: i32, %arg2: memref<16x32xbf16, #tpu.memory_space<vmem>>, %arg3: memref<32x128xbf16, #tpu.memory_space<vmem>>, %arg4: memref<1x128xbf16, #tpu.memory_space<vmem>>, %arg5: memref<128x32xbf16, #tpu.memory_space<vmem>>, %arg6: memref<1x32xbf16, #tpu.memory_space<vmem>>, %arg7: memref<16x32xbf16, #tpu.memory_space<vmem>>, %arg8: memref<16x32xf32, #tpu.memory_space<vmem>>) attributes {dimension_semantics = [#tpu.dimension_semantics<parallel>, #tpu.dimension_semantics<arbitrary>], iteration_bounds = array<i64: 1, 1>, scalar_prefetch = 0 : i64, scratch_operands = 1 : i64, tpu.core_type = #tpu.core_type<tc>, window_params = [{transform_indices = @transform_0, window_bounds = array<i64: 16, 32>}, {transform_indices = @transform_1, window_bounds = array<i64: 32, 128>}, {transform_indices = @transform_2, window_bounds = array<i64: 1, 128>}, {transform_indices = @transform_3, window_bounds = array<i64: 128, 32>}, {pipeline_mode = #tpu.pipeline_mode<synchronous>, transform_indices = @transform_4, window_bounds = array<i64: 1, 32>}, {transform_indices = @transform_5, window_bounds = array<i64: 16, 32>}]} {
    %c0_i32 = arith.constant 0 : i32
    %0 = arith.cmpi eq, %arg1, %c0_i32 : i32
    %1 = arith.extui %0 : i1 to i32
    %c0_i32_0 = arith.constant 0 : i32
    %2 = arith.cmpi ne, %1, %c0_i32_0 : i32
    scf.if %2 {
      %cst_16 = arith.constant 0.000000e+00 : f32
      %21 = vector.broadcast %cst_16 : f32 to vector<16x32xf32>
      %c0_17 = arith.constant 0 : index
      %c0_18 = arith.constant 0 : index
      %22 = vector.load %arg8[%c0_17, %c0_18] : memref<16x32xf32, #tpu.memory_space<vmem>>, vector<16x32xf32>
      tpu.vector_store %arg8[%c0_17, %c0_18], %21 {strides = array<i32>} : memref<16x32xf32, #tpu.memory_space<vmem>>, vector<16x32xf32>,
    } else {
    }
    %c0 = arith.constant 0 : index
    %c0_1 = arith.constant 0 : index
    %3 = vector.load %arg2[%c0, %c0_1] : memref<16x32xbf16, #tpu.memory_space<vmem>>, vector<16x32xbf16>
    %c0_2 = arith.constant 0 : index
    %c0_3 = arith.constant 0 : index
    %4 = vector.load %arg3[%c0_2, %c0_3] : memref<32x128xbf16, #tpu.memory_space<vmem>>, vector<32x128xbf16>
    %cst = arith.constant dense<0.000000e+00> : vector<16x128xf32>
    %5 = tpu.matmul %3, %4, %cst {dimension_numbers = #tpu.dot_dimension_numbers<[1], [0], [0], [1], [0, 0, 1, 1], [], []>} : vector<16x32xbf16>, vector<32x128xbf16>, vector<16x128xf32> -> vector<16x128xf32>
    %c0_4 = arith.constant 0 : index
    %c0_5 = arith.constant 0 : index
    %6 = vector.load %arg4[%c0_4, %c0_5] : memref<1x128xbf16, #tpu.memory_space<vmem>>, vector<1x128xbf16>
    %7 = arith.extf %6 : vector<1x128xbf16> to vector<1x128xf32>
    %8 = vector.broadcast %7 : vector<1x128xf32> to vector<16x128xf32>
    %9 = arith.addf %5, %8 : vector<16x128xf32>
    %cst_6 = arith.constant 0.000000e+00 : f32
    %10 = vector.broadcast %cst_6 : f32 to vector<16x128xf32>
    %11 = arith.maximumf %9, %10 : vector<16x128xf32>
    %12 = arith.truncf %11 : vector<16x128xf32> to vector<16x128xbf16>
    %c0_7 = arith.constant 0 : index
    %c0_8 = arith.constant 0 : index
    %13 = vector.load %arg8[%c0_7, %c0_8] : memref<16x32xf32, #tpu.memory_space<vmem>>, vector<16x32xf32>
    %c0_9 = arith.constant 0 : index
    %c0_10 = arith.constant 0 : index
    %14 = vector.load %arg5[%c0_9, %c0_10] : memref<128x32xbf16, #tpu.memory_space<vmem>>, vector<128x32xbf16>
    %cst_11 = arith.constant dense<0.000000e+00> : vector<16x32xf32>
    %15 = tpu.matmul %12, %14, %cst_11 {dimension_numbers = #tpu.dot_dimension_numbers<[1], [0], [0], [1], [0, 0, 1, 1], [], []>} : vector<16x128xbf16>, vector<128x32xbf16>, vector<16x32xf32> -> vector<16x32xf32>
    %16 = arith.addf %13, %15 : vector<16x32xf32>
    %c0_12 = arith.constant 0 : index
    %c0_13 = arith.constant 0 : index
    %17 = vector.load %arg8[%c0_12, %c0_13] : memref<16x32xf32, #tpu.memory_space<vmem>>, vector<16x32xf32>
    tpu.vector_store %arg8[%c0_12, %c0_13], %16 {strides = array<i32>} : memref<16x32xf32, #tpu.memory_space<vmem>>, vector<16x32xf32>,
    %c0_i32_14 = arith.constant 0 : i32
    %18 = arith.cmpi eq, %arg1, %c0_i32_14 : i32
    %19 = arith.extui %18 : i1 to i32
    %c0_i32_15 = arith.constant 0 : i32
    %20 = arith.cmpi ne, %19, %c0_i32_15 : i32
    scf.if %20 {
      %c0_16 = arith.constant 0 : index
      %c0_17 = arith.constant 0 : index
      %21 = vector.load %arg8[%c0_16, %c0_17] : memref<16x32xf32, #tpu.memory_space<vmem>>, vector<16x32xf32>
      %c0_18 = arith.constant 0 : index
      %c0_19 = arith.constant 0 : index
      %22 = vector.load %arg6[%c0_18, %c0_19] : memref<1x32xbf16, #tpu.memory_space<vmem>>, vector<1x32xbf16>
      %23 = arith.extf %22 : vector<1x32xbf16> to vector<1x32xf32>
      %24 = vector.broadcast %23 : vector<1x32xf32> to vector<16x32xf32>
      %25 = arith.addf %21, %24 : vector<16x32xf32>
      %26 = arith.truncf %25 : vector<16x32xf32> to vector<16x32xbf16>
      %c0_20 = arith.constant 0 : index
      %c0_21 = arith.constant 0 : index
      %27 = vector.load %arg7[%c0_20, %c0_21] : memref<16x32xbf16, #tpu.memory_space<vmem>>, vector<16x32xbf16>
      tpu.vector_store %arg7[%c0_20, %c0_21], %26 {strides = array<i32>} : memref<16x32xbf16, #tpu.memory_space<vmem>>, vector<16x32xbf16>,
    } else {
    }
    return
  }
  func.func @transform_0(%arg0: i32, %arg1: i32) -> (i32, i32) {
    %c0_i32 = arith.constant 0 : i32
    %c0_i32_0 = arith.constant 0 : i32
    return %arg0, %c0_i32 : i32, i32
  }
  func.func @transform_1(%arg0: i32, %arg1: i32) -> (i32, i32) {
    %c0_i32 = arith.constant 0 : i32
    %c0_i32_0 = arith.constant 0 : i32
    return %c0_i32, %arg1 : i32, i32
  }
  func.func @transform_2(%arg0: i32, %arg1: i32) -> (i32, i32) {
    %c0_i32 = arith.constant 0 : i32
    %c0_i32_0 = arith.constant 0 : i32
    return %c0_i32, %arg1 : i32, i32
  }
  func.func @transform_3(%arg0: i32, %arg1: i32) -> (i32, i32) {
    %c0_i32 = arith.constant 0 : i32
    %c0_i32_0 = arith.constant 0 : i32
    return %arg1, %c0_i32 : i32, i32
  }
  func.func @transform_4(%arg0: i32, %arg1: i32) -> (i32, i32) {
    %c0_i32 = arith.constant 0 : i32
    %c0_i32_0 = arith.constant 0 : i32
    %c0_i32_1 = arith.constant 0 : i32
    return %c0_i32, %c0_i32_0 : i32, i32
  }
  func.func @transform_5(%arg0: i32, %arg1: i32) -> (i32, i32) {
    %c0_i32 = arith.constant 0 : i32
    %c0_i32_0 = arith.constant 0 : i32
    return %arg0, %c0_i32 : i32, i32
  }
}

</mosaic_0001>

<bundles_post_ra>
// kernel: mlp_forward.1
= control target key start
LH: loop header
LB: loop body
LE: loop exit
PB: predicated region body
PF: predicated region fallthrough
CT: control target
= control target key end

     0   :  { %v353_v1 = vmov 0.0   ;;  %vm354_vm0 = vmmov 0   ;;  %vm26_vm1 = vcmask 261120   ;;  %s444_s0 = inlined_call_operand.vmem [shape: bf16[16,32], index: 0, kind: input, shape index: {}]   ;;  %s445_s1 = inlined_call_operand.vmem [shape: bf16[32,128], index: 1, kind: input, shape index: {}]   ;;  %s446_s2 = inlined_call_operand.vmem [shape: bf16[1,128], index: 2, kind: input, shape index: {}]   ;;  %s447_s3 = inlined_call_operand.vmem [shape: bf16[128,32], index: 3, kind: input, shape index: {}]   ;;  %s448_s4 = inlined_call_operand.vmem [shape: bf16[1,32], index: 4, kind: input, shape index: {}]   ;;  %s449_s5 = inlined_call_operand.hbm [shape: bf16[16,32], index: 5, kind: output, shape index: {}]  }
   0x1   :  { %v318_v0 = vld [vmem:[%s445_s1] sm:$0xff]   ;;  %285 = vmatprep.subr.bf16.mxu0 %v353_v1  ;;  %293 = vmatprep.subr.bf16.mxu1 %v353_v1  ;;  %v319_v2 = vld [vmem:[%s445_s1 + $0x8] sm:$0xff]   ;;  %27 = vst.msk [vmem:[#allocation2] sm:$0xff] %vm26_vm1, %v353_v1  ;;  %28 = vst.msk [vmem:[#allocation2 + $0x8] sm:$0xff] %vm26_vm1, %v353_v1 }
   0x2   :  { %286 = vmatpush3.bf16.msra.mxu0 %v318_v0  ;;  %289 = vmatprep.mubr.msk.bf16.mxu0 %vm354_vm0, %v353_v1  ;;  %v321_v3 = vld [vmem:[%s447_s3] sm:$0xff]   ;;  %v322_v5 = vld [vmem:[%s447_s3 + $0x8] sm:$0xff]   ;;  %v323_v6 = vld [vmem:[%s447_s3 + $0x10] sm:$0xff]  }
   0x3   :  { %287 = vmatprep.subr.bf16.mxu0 %v353_v1  ;;  %309 = vmatprep.mubr.msk.bf16.mxu1 %vm354_vm0, %v353_v1  ;;  %v320_v4 = vld [vmem:[%s444_s0] sm:$0xff]  }
   0x4   :  { %294 = vmatpush3.bf16.msra.mxu1 %v321_v3 }
   0x5   :  { %295 = vmatprep.subr.bf16.mxu1 %v353_v1 }
   0x6   :  { %288 = vmatpush3.bf16.msra.mxu0 %v319_v2 }
   0x8   :  { %296 = vmatpush3.bf16.msra.mxu1 %v322_v5 }
   0x9   :  { %290 = vmatmul.mubr.msk.bf16.vlgmr.msra.gmra.mrb[0].mxu0 %vm26_vm1, %v320_v4  ;;  %297 = vmatprep.subr.bf16.mxu1 %v353_v1 }
   0xa   :  { %10 = vsyncpa [#allocation4], 0  ;;  %v324_v7 = vld [vmem:[%s447_s3 + $0x18] sm:$0xff]   ;;  %v325_v8 = vld [vmem:[%s447_s3 + $0x20] sm:$0xff]   ;;  %v37_v12 = vlaneseq  ;;  %vm238_vm2 = vcmask 257024  }
   0xb   :  { %v326_v9 = vld [vmem:[%s447_s3 + $0x28] sm:$0xff]   ;;  %v327_v10 = vld [vmem:[%s447_s3 + $0x30] sm:$0xff]   ;;  %v328_v11 = vld [vmem:[%s447_s3 + $0x38] sm:$0xff]  }
   0xc   :  { %298 = vmatpush3.bf16.msra.mxu1 %v323_v6  ;;  %v38_v13 = vshrl.u32 %v37_v12, 7  ;;  %v35_v14 = vld [vmem:[%s446_s2] sm:$0x1]  ;;  %v107_v30 = vld [vmem:[#allocation2 + $0x8] sm:$0xff]  ;;  %s355_s2 = smov [#allocation3]  }
   0xd   :  { %299 = vmatprep.subr.bf16.mxu1 %v353_v1  ;;  %v36_v15 = vunpack.c.l.bf16 %v35_v14  ;;  %v106_v27 = vld [vmem:[#allocation2] sm:$0xff]  ;;  %s246_s16 = sshll.u32 %s355_s2, 4  ;;  %s247_s16 = int_to_ptr.vmem [resolvable:$true] %s246_s16 }
   0xe   :  { %v39_v16 = vsub.s32 0, %v38_v13  ;;  %v222_v28 = vld [vmem:[%s448_s4] sm:$0x1]  ;;  %s329_s4 = scalar_lea.vmem %s247_s16, 128  ;;  %p334_p1 = scmp.lt.s32.totalorder %s247_s16, %s247_s16 }
   0xf   :  { %v223_v34 = vunpack.c.l.bf16 %v222_v28  ;;  %p330_p0 = scmp.ne.s32.totalorder %s247_s16, %s329_s4  ;;  %p335_p2 = scmp.lt.s32.totalorder %s329_s4, %s329_s4 }
  0x10   :  { %300 = vmatpush3.bf16.msra.mxu1 %v324_v7  ;;  %v40_v17 = vrot.slane %v36_v15, %v39_v16 }
  0x11   :  { %301 = vmatprep.subr.bf16.mxu1 %v353_v1  ;;  %v227_v37 = vrot.slane %v223_v34, %v39_v16  ;;  %p336_p3 = por %p335_p2, %p334_p1 }
  0x13   :  { %p337_p4 = pnand %p336_p3, %p330_p0 }
  0x14   :  { %302 = vmatpush3.bf16.msra.mxu1 %v325_v8 }
  0x15   :  { %303 = vmatprep.subr.bf16.mxu1 %v353_v1 }
  0x18   :  { %304 = vmatpush3.bf16.msra.mxu1 %v326_v9 }
  0x19   :  { %305 = vmatprep.subr.bf16.mxu1 %v353_v1 }
  0x1c   :  { %306 = vmatpush3.bf16.msra.mxu1 %v327_v10 }
  0x1d   :  { %307 = vmatprep.subr.bf16.mxu1 %v353_v1 }
  0x20   :  { %308 = vmatpush3.bf16.msra.mxu1 %v328_v11 }
  0xdc   :  { %v96_v18 = vpop.f32.mrb[0].mxu0 }
  0xdd   :  { %v97_v19 = vadd.f32 %v96_v18, %v40_v17  ;;  %v291_v20 = vpop.f32.mrb[1].mxu0 }
  0xde   :  { %v99_v21 = vpop.f32.mrb[2].mxu0 }
  0xdf   :  { %v100_v22 = vadd.f32 %v99_v21, %v40_v17  ;;  %v292_v23 = vpop.f32.mrb[3].mxu0  ;;  %v103_v24 = vmax.f32 %v97_v19, 0.0 }
  0xe1   :  { %v104_v25 = vmax.f32 %v100_v22, 0.0 }
  0xe3   :  { %v105_v26 = vpack.c.bf16 %v104_v25, %v103_v24 }
  0xe5   :  { %310 = vmatmul.mubr.bf16.vlgmr.msra.gmra.mrb[0].mxu1 %v105_v26 }
 0x1b8   :  { %v206_v29 = vpop.f32.mrb[0].mxu1 }
 0x1b9   :  { %v213_v31 = vadd.f32 %v206_v29, %v106_v27  ;;  %v311_v32 = vpop.f32.mrb[1].mxu1 }
 0x1ba   :  { %v209_v33 = vpop.f32.mrb[2].mxu1 }
 0x1bb   :  { %215 = vst.msk [vmem:[#allocation2] sm:$0xff] %vm26_vm1, %v213_v31  ;;  %v214_v35 = vadd.f32 %v209_v33, %v107_v30  ;;  %v312_v36 = vpop.f32.mrb[3].mxu1 }
 0x1bd   :  { %216 = vst.msk [vmem:[#allocation2 + $0x8] sm:$0xff] %vm26_vm1, %v214_v35 }
 0x1c2   :  { %v220_v38 = vld [vmem:[#allocation2] sm:$0xff] }
 0x1c3   :  { %v228_v39 = vadd.f32 %v227_v37, %v220_v38 }
 0x1c4   :  { %v221_v40 = vld [vmem:[#allocation2 + $0x8] sm:$0xff] }
 0x1c5   :  { %v229_v41 = vadd.f32 %v227_v37, %v221_v40  ;;  %v271_v42 = vpack.c.bf16 %v228_v39, %v228_v39 }
 0x1c7   :  { %v272_v43 = vpack.c.bf16 %v229_v41, %v229_v41  ;;  %239 = vst.msk [vmem:[#allocation3] sm:$0xf] %vm238_vm2, %v271_v42 }
 0x1c9   :  { %240 = vst.msk [vmem:[#allocation3 + $0x4] sm:$0xf] %vm238_vm2, %v272_v43 }
 0x1ca   :  { %340 = shalt.err (!%p337_p4)
}
 0x1cb   :  { %s341_s19 = scalar_lea.hbm %s449_s5, 128 }
 0x1cc   :  { %p342_p5 = scmp.ne.s32.totalorder %s449_s5, %s341_s19  ;;  %p345_p6 = scmp.lt.u32.totalorder %s341_s19, %s449_s5 }
 0x1ce   :  { %p347_p7 = pnand %p345_p6, %p342_p5 }
 0x1d0   :  { %350 = shalt.err (!%p347_p7)
}
 0x1d1   :  { %s356_s24 = smov 64   ;;  %s357_s25 = smov 4  }
 0x1d2   :  { %252 = dma.vmem_to_hbm [thread:$0]  %s247_s16, 128, %s449_s5, [#allocation4], %s356_s24, %s356_s24, %s357_s25  }
 0x1d3   :  { %351 = dma.done.wait [#allocation4], 128  }
 0x1d4   :  { %352 = vsyncadd [#allocation4], 4294967168 }
 0x1d5   :  { %256 = vsyncpa [#allocation4], 1 }

</bundles_post_ra>
